<compile_context>
chip_gen: v7x
topology: tpu7x:2x2x1
jax: 0.10.0
libtpu: 0.0.40
codegen_flags: <defaults>
</compile_context>

<pallas_src>
import math

import jax
import jax.numpy as jnp
from jax.experimental import pallas as pl
from jax.experimental.pallas import tpu as pltpu


def _round_up(x, m):
    return ((x + m - 1) // m) * m


def _make_permute_kernel(local_perm):
    """In-kernel transpose over the non-squeezed (kept) block axes only."""
    rank = len(local_perm)
    if local_perm == tuple(range(rank)):
        def kernel(x_ref, o_ref):
            o_ref[...] = x_ref[...]
    elif rank <= 2:
        # 2-D minor transpose: a single XLU transpose.
        def kernel(x_ref, o_ref):
            o_ref[...] = jnp.transpose(x_ref[...], local_perm)
    else:
        # >=3-D kept block: einshape is lane-layout aware and avoids spurious
        # relayout copies jnp.transpose can introduce on >2-D VMEM blocks.
        letters = "abcdefgh"
        eq = letters[:rank] + "->" + "".join(letters[p] for p in local_perm)
        def kernel(x_ref, o_ref):
            o_ref[...] = pltpu.einshape(eq, x_ref[...])
    return kernel


def _make_in_spec(block_shape, index_map, buffer_count):
    """Input BlockSpec; deeper pipelining (3 buffers) when requested/possible."""
    if buffer_count > 2:
        try:
            return pl.BlockSpec(block_shape, index_map,
                                pipeline_mode=pl.Buffered(buffer_count))
        except Exception:   # pipeline_mode/Buffered unsupported -> default 2
            pass
    return pl.BlockSpec(block_shape, index_map)


def nn_permute(x, perm):
    """X.permute(perm) (torch semantics == jnp.transpose(x, perm)) via Pallas."""
    perm = tuple(int(p) for p in perm)
    n = x.ndim
    assert sorted(perm) == list(range(n)), "invalid permutation"
    if perm == tuple(range(n)):
        return x

    out_shape = tuple(x.shape[p] for p in perm)
    itemsize = jnp.dtype(x.dtype).itemsize
    # Sublane granule per dtype packing: 8 (f32), 16 (bf16), 32 (int8/fp8).
    sub_g = max(8, 32 // max(itemsize, 1))

    # ---- 1. Merge adjacent input axes that stay adjacent & in order in the
    #         output (standard transpose normalization) -> irreducible perm q.
    pos_in_out = [0] * n
    for i, p in enumerate(perm):
        pos_in_out[p] = i
    groups = [[0]]
    for a in range(1, n):
        if pos_in_out[a] == pos_in_out[a - 1] + 1:
            groups[-1].append(a)
        else:
            groups.append([a])
    r = len(groups)
    m_in_shape = tuple(math.prod(x.shape[a] for a in g) for g in groups)
    order = sorted(range(r), key=lambda gi: pos_in_out[groups[gi][0]])
    q = tuple(order)                      # merged out axis i <- merged in axis q[i]
    m_out_shape = tuple(m_in_shape[a] for a in q)
    inv_q = [0] * r
    for i, a in enumerate(q):
        inv_q[a] = i

    if r == 1:                            # degenerate (identity after merging)
        return x.reshape(out_shape)

    # ---- 2. Generation-aware VMEM budget (do NOT hard-code 64 MiB).
    try:
        vmem_cap = int(pltpu.get_tpu_info().vmem_capacity_bytes)
    except Exception:
        vmem_cap = 64 * 1024 * 1024       # conservative fallback (v7x-sized)
    # v7x (64 MiB phys) -> ~48 MiB limit; v5e/v6e (128 MiB) -> ~100 MiB.
    vmem_limit = max(32 << 20, min(vmem_cap - (16 << 20), int(vmem_cap * 0.78)))
    margin = 4 << 20                      # Mosaic internal scratch, semaphores

    # ---- 3. Block structure: tile the axes that actually swap; grid the rest.
    lane_axes = {r - 1, q[r - 1]}         # minor (lane) role in input / output
    sub_axes = {r - 2, q[r - 2]}          # second-minor (sublane) roles
    kept = sorted(lane_axes | sub_axes)   # block axes; all others -> grid
    kept_set = set(kept)
    kept_out = [q[i] for i in range(r) if q[i] in kept_set]

    def _tile(dim, granule_, cap):
        if dim <= cap:
            return dim                    # full extent: always layout-legal
        return max(granule_, (cap // granule_) * granule_)

    def _phys_bytes(dims):
        # VMEM footprint of one buffer, incl. (sublane, lane) padding.
        if len(dims) == 1:
            return _round_up(dims[0], 128) * itemsize
        lead = math.prod(dims[:-2]) if len(dims) > 2 else 1
        return lead * _round_up(dims[-2], sub_g) * _round_up(dims[-1], 128) * itemsize

    lane_cap, sub_cap = 1024, 1024
    while True:
        tiles = {a: (_tile(m_in_shape[a], 128, lane_cap) if a in lane_axes
                     else _tile(m_in_shape[a], sub_g, sub_cap))
                 for a in kept}
        in_phys = _phys_bytes([tiles[a] for a in kept])
        out_phys = _phys_bytes([tiles[a] for a in kept_out])
        if 2 * (in_phys + out_phys) + margin <= vmem_limit:
            break
        if sub_cap > 128:
            sub_cap //= 2
        elif lane_cap > 128:
            lane_cap //= 2
        elif sub_cap > sub_g:
            sub_cap //= 2
        else:
            break                         # already at the smallest legal tiles

    blk_bytes = math.prod(tiles.values()) * itemsize
    # Triple-buffer the input when blocks are small and headroom allows
    # (keeps the default 2 when that would pressure v7x's smaller VMEM).
    in_bufs = 2
    if blk_bytes <= (512 << 10) and 3 * in_phys + 2 * out_phys + margin <= vmem_limit:
        in_bufs = 3

    # Grid: one axis per squeezed (batch-like) merged axis plus one per tiled
    # kept axis; ordered so consecutive steps sweep the output row-major.
    grid_axes = [a for a in range(r)
                 if a not in tiles or tiles[a] < m_in_shape[a]]
    grid_axes.sort(key=lambda a: inv_q[a])
    gpos = {a: i for i, a in enumerate(grid_axes)}
    grid = tuple(pl.cdiv(m_in_shape[a], tiles.get(a, 1)) for a in grid_axes)
    if not grid:
        grid = (1,)

    def _in_block_dim(a):
        if a not in tiles:
            return None                   # size-1, squeezed out of the kernel ref
        return tiles[a]

    in_block = tuple(_in_block_dim(a) for a in range(r))
    out_block = tuple(_in_block_dim(q[i]) for i in range(r))

    def _axis_index(a, g):
        return g[gpos[a]] if a in gpos else 0

    def in_index_map(*g):
        return tuple(_axis_index(a, g) for a in range(r))

    def out_index_map(*g):
        return tuple(_axis_index(q[i], g) for i in range(r))

    # Minimal-rank in-kernel transpose (over the kept axes only).
    local_perm = tuple(kept.index(a) for a in kept_out)
    kernel = _make_permute_kernel(local_perm)

    x_m = x.reshape(m_in_shape)

    def _build_and_run(bufs):
        return pl.pallas_call(
            kernel,
            out_shape=jax.ShapeDtypeStruct(m_out_shape, x.dtype),
            grid_spec=pltpu.PrefetchScalarGridSpec(
                num_scalar_prefetch=0,
                grid=grid,
                in_specs=[_make_in_spec(in_block, in_index_map, bufs)],
                out_specs=pl.BlockSpec(out_block, out_index_map),
            ),
            compiler_params=pltpu.CompilerParams(
                dimension_semantics=("parallel",) * len(grid),
                vmem_limit_bytes=int(vmem_limit),
            ),
            cost_estimate=pl.CostEstimate(
                flops=0,
                transcendentals=0,
                bytes_accessed=int(2 * x.size * itemsize),
            ),
        )(x_m)

    if in_bufs > 2:
        try:
            out_m = _build_and_run(in_bufs)
        except Exception:
            out_m = _build_and_run(2)     # default double-buffered pipeline
    else:
        out_m = _build_and_run(2)

    return out_m.reshape(out_shape)


class nnPermute:
    """Pallas-backed equivalent of the PyTorch nnPermute module."""

    def __init__(self, shape):
        self.shape = tuple(shape)

    def __call__(self, X):
        return nn_permute(X, self.shape)


if __name__ == "__main__":
    key = jax.random.PRNGKey(0)
    k1, k2, k3 = jax.random.split(key, 3)

    # Test 1: NCHW -> NHWC, the canonical use of nnPermute (small C).
    x1 = jax.random.normal(k1, (2, 4, 16, 16), dtype=jnp.float32)
    p1 = (0, 2, 3, 1)
    y1 = nnPermute(p1)(x1)
    jax.block_until_ready(y1)
    y1_ref = jnp.transpose(x1, p1)
    assert y1.shape == y1_ref.shape
    assert bool(jnp.array_equal(y1, y1_ref))

    # Test 2: swap the two minor dims; exercises merging of the (N, C) axes.
    x2 = jax.random.normal(k2, (2, 4, 8, 128), dtype=jnp.float32)
    p2 = (0, 1, 3, 2)
    y2 = nnPermute(p2)(x2)
    jax.block_until_ready(y2)
    assert bool(jnp.array_equal(y2, jnp.transpose(x2, p2)))

    # Test 3: plain 2-D transpose with non-128-multiple dims; exercises the
    # cdiv tiling of both swapped axes, partial edge blocks and a real grid.
    x3 = jax.random.normal(k3, (1100, 1300), dtype=jnp.float32)
    p3 = (1, 0)
    y3 = nnPermute(p3)(x3)
    jax.block_until_ready(y3)
    assert bool(jnp.array_equal(y3, jnp.transpose(x3, p3)))

    print("KERNEL_OK")
</pallas_src>

<mosaic_0001>
module attributes {stable_mosaic.version = 11 : i64} {
  func.func @kernel(%arg0: i32, %arg1: memref<1x4x256xf32, #tpu.memory_space<vmem>>, %arg2: memref<1x256x4xf32, #tpu.memory_space<vmem>>) attributes {dimension_semantics = [#tpu.dimension_semantics<parallel>], iteration_bounds = array<i64: 2>, scalar_prefetch = 0 : i64, scratch_operands = 0 : i64, tpu.core_type = #tpu.core_type<tc>, window_params = [{transform_indices = @transform_0, window_bounds = array<i64: 1, 4, 256>}, {transform_indices = @transform_1, window_bounds = array<i64: 1, 256, 4>}]} {
    %c0 = arith.constant 0 : index
    %c0_0 = arith.constant 0 : index
    %c0_1 = arith.constant 0 : index
    %0 = vector.load %arg1[%c0, %c0_0, %c0_1] : memref<1x4x256xf32, #tpu.memory_space<vmem>>, vector<1x4x256xf32>
    %1 = vector.shape_cast %0 : vector<1x4x256xf32> to vector<4x256xf32>
    %2 = tpu.transpose %1, [1, 0] : vector<4x256xf32> -> vector<256x4xf32>
    %c0_2 = arith.constant 0 : index
    %c0_3 = arith.constant 0 : index
    %c0_4 = arith.constant 0 : index
    %3 = vector.load %arg2[%c0_2, %c0_3, %c0_4] : memref<1x256x4xf32, #tpu.memory_space<vmem>>, vector<1x256x4xf32>
    %4 = vector.shape_cast %3 : vector<1x256x4xf32> to vector<256x4xf32>
    %5 = vector.shape_cast %2 : vector<256x4xf32> to vector<1x256x4xf32>
    tpu.vector_store %arg2[%c0_2, %c0_3, %c0_4], %5 {strides = array<i32>} : memref<1x256x4xf32, #tpu.memory_space<vmem>>, vector<1x256x4xf32>,
    return
  }
  func.func @transform_0(%arg0: i32) -> (i32, i32, i32) {
    %c0_i32 = arith.constant 0 : i32
    %c0_i32_0 = arith.constant 0 : i32
    %c0_i32_1 = arith.constant 0 : i32
    return %arg0, %c0_i32, %c0_i32_0 : i32, i32, i32
  }
  func.func @transform_1(%arg0: i32) -> (i32, i32, i32) {
    %c0_i32 = arith.constant 0 : i32
    %c0_i32_0 = arith.constant 0 : i32
    %c0_i32_1 = arith.constant 0 : i32
    return %arg0, %c0_i32, %c0_i32_0 : i32, i32, i32
  }
}

</mosaic_0001>

<bundles_post_ra>
// kernel: tpu_custom_call.1
= control target key start
LH: loop header
LB: loop body
LE: loop exit
PB: predicated region body
PF: predicated region fallthrough
CT: control target
= control target key end

     0   :  { %6 = vsyncpa [#allocation3], 0  ;;  %s608_s0 = inlined_call_operand.hbm [shape: f32[2,4,256], index: 0, kind: input, shape index: {}]   ;;  %s609_s1 = inlined_call_operand.vmem [shape: f32[2,256,4], index: 1, kind: output, shape index: {}]  }
   0x1   :  { %8 = vsyncpa [#allocation3 + $0x1], 0  ;;  %s435_s6 = smov 0   ;;  %s437_s7 = smov 0  }
   0x2   :  { %s439_s8 = smov 0   ;;  %s441_s9 = smov 0  }
   0x3 LB: > { %s454_s10 = sadd.s32 4294967295, %s422_s9   ;;  %s457_s11 = sadd.s32 1, %s422_s9   ;;  %s422_s9 = sphi %s441_s9, %s617_s9   ;;  %s418_s8 = sphi %s439_s8, %s616_s8   ;;  %s414_s7 = sphi %s437_s7, %s615_s7   ;;  %s410_s6 = sphi %s435_s6, %s614_s6  }
   0x4   : > { %s18_s12 = ssub.s32 %s422_s9, %s457_s11  ;;  %s21_s13 = sadd.s32 1, %s418_s8 }
   0x5   : > { %p19_p0 = scmp.eq.s32.totalorder %s18_s12, 0  ;;  %p28_p1 = scmp.ne.s32.totalorder %s418_s8, %s414_s7 }
   0x6   : > { %p29_p2 = scmp.eq.s32.totalorder %s422_s9, 0  ;;  %p34_p3 = scmp.ne.s32.totalorder %s414_s7, %s410_s6 }
   0x7   : > { %s467_s14 = scalar_select %p19_p0, %s418_s8, %s21_s13  }
   0x8   : > { %p30_p4 = por %p29_p2, %p28_p1  ;;  %p35_p5 = scmp.eq.s32.totalorder %s454_s10, 0 }
   0x9   : > { %p323_p6 = scmp.lt.s32.totalorder %s422_s9, 2  ;;  %s84_s16 = sand.u32 1, %s418_s8  }
   0xa   : > { %p471_p7 = por %p35_p5, %p34_p3  ;;  %s306_s17 = sshll.u32 %s84_s16, 3 }
   0xb   : > { %s315_s18 = sshll.u32 %s422_s9, 7  ;;  %s88_s22 = scalar_lea.vmem [#allocation2], %s306_s17 }
   0xc   : > { %s480_s21 = scalar_lea.hbm %s608_s0, %s315_s18  ;;  %s96_s23 = sshll.u32 %s88_s22, 4  ;;  %s482_s23 = int_to_ptr.vmem [resolvable:$true] %s96_s23 }
   0xd   : > { %p484_p8 = pnand %p323_p6, %p30_p4  ;;  %s85_s25 = scalar_lea.sflag [#allocation3], %s84_s16 }
   0xe   : > { %s358_s26 = scalar_lea.hbm %s480_s21, 128  ;;  %s363_s29 = scalar_lea.hbm %s608_s0, 256 }
   0xf   : > { %p359_p11 = scmp.ne.s32.totalorder %s480_s21, %s358_s26  ;;  %p360_p12 = pneg %p484_p8 }
  0x10   : > { %p364_p1 = scmp.lt.u32.totalorder %s480_s21, %s608_s0  ;;  %p365_p2 = scmp.lt.u32.totalorder %s363_s29, %s358_s26 }
  0x11   : > { %p361_p13 = pnand %p360_p12, %p359_p11  ;;  %p367_p4 = scmp.lt.u32.totalorder %s358_s26, %s480_s21 }
  0x12   : > { %p366_p3 = por %p365_p2, %p364_p1 }
  0x13   : > { %p362_p0 = pneg %p361_p13 }
  0x14   : > { %p368_p5 = por %p367_p4, %p366_p3 }
  0x16   : > { %p369_p6 = pnand %p368_p5, %p362_p0 }
  0x18   : > { %372 = shalt.err (!%p369_p6)
}
  0x19   : > { %s373_s3 = scalar_lea.vmem %s482_s23, 128  ;;  %s424_s4 = smov [#allocation2]  }
  0x1a   : > { %p374_p11 = scmp.ne.s32.totalorder %s482_s23, %s373_s3  ;;  %s378_s5 = sshll.u32 %s424_s4, 4  ;;  %s379_s5 = int_to_ptr.vmem [resolvable:$false] %s378_s5 }
  0x1b   : > { %s380_s6 = scalar_lea.vmem %s379_s5, 256  ;;  %p381_p10 = scmp.lt.s32.totalorder %s482_s23, %s379_s5 }
  0x1c   : > { %p376_p13 = pnand %p374_p11, %p360_p12  ;;  %p382_p1 = scmp.lt.s32.totalorder %s380_s6, %s373_s3 }
  0x1e   : > { %p377_p9 = pneg %p376_p13  ;;  %p383_p2 = por %p382_p1, %p381_p10 }
  0x20   : > { %p384_p3 = pnand %p383_p2, %p377_p9 }
  0x22   : > { %387 = shalt.err (!%p384_p3)
}
  0x23   : > { %322 = dma.hbm_to_vmem [thread:$0]  (!%p484_p8), %s480_s21, 128, %s482_s23, %s85_s25  }
  0x24   : > { %p612_p0 = scmp.lt.s32.totalorder %s422_s9, 3  ;;  %p613_p4 = scmp.ge.s32.totalorder %s422_s9, 1 }
  0x26   : > { %p102_p12 = pnand %p613_p4, %p612_p0 }
  0x27   : > { %s107_s12 = sand.u32 (!%p102_p12), 1, %s414_s7  }
  0x28   : > { %105 = sbr.rel (%p102_p12) target bundleno = 303 (0x12f), region = 24  ;;  %s310_s13 = sshll.u32 (!%p102_p12), %s107_s12, 3 }
  0x29   : > { %s108_s16 = scalar_lea.sflag (!%p102_p12), [#allocation3], %s107_s12  ;;  %s111_s17 = scalar_lea.vmem (!%p102_p12), [#allocation2], %s310_s13 }
  0x2f   : > { %405 = dma.done.wait (%p471_p7), %s108_s16, 128  }
  0x30   : > { %407 = vsyncadd (%p471_p7), %s108_s16, 4294967168  ;;  %v135_v0 = vld [vmem:[%s111_s17] sm:$0xff]  ;;  %p130_p8 = scmp.lt.s32.totalorder %s454_s10, 1  ;;  %vm203_vm0 = vcmask 31744  }
  0x31   : > { %139 = vxpose.xlu0.b32.start.end [1/1] (short) %v135_v0, 128  ;;  %v137_v1 = vcombine.high %v135_v0, %v135_v0 }
  0x32   : > { %s619_s10 = smov (!%p130_p8, %s454_s10), 1 }
  0x33   : > { %s316_s9 = sshll.u32 %s619_s10, 8 }
  0x34   : > { %s529_s20 = scalar_lea.vmem %s609_s1, %s316_s9 }
  0x6e   : > { %171 = vxpose.xlu0.b32.start.end [1/1] (short) %v137_v1, 128 }
  0xb1   : > { %v155_v2 = vpop.trf.xlu0 }
  0xb2   : > { %204 = vst.msk [vmem:[%s529_s20] sm:$0xff] %vm203_vm0, %v155_v2 }
  0xb5   : > { %v156_v3 = vpop.trf.xlu0 }
  0xb6   : > { %205 = vst.msk [vmem:[%s529_s20 + $0x8] sm:$0xff] %vm203_vm0, %v156_v3 }
  0xb9   : > { %v157_v4 = vpop.trf.xlu0 }
  0xba   : > { %206 = vst.msk [vmem:[%s529_s20 + $0x10] sm:$0xff] %vm203_vm0, %v157_v4 }
  0xbd   : > { %v158_v5 = vpop.trf.xlu0 }
  0xbe   : > { %207 = vst.msk [vmem:[%s529_s20 + $0x18] sm:$0xff] %vm203_vm0, %v158_v5 }
  0xc1   : > { %v159_v6 = vpop.trf.xlu0 }
  0xc2   : > { %208 = vst.msk [vmem:[%s529_s20 + $0x20] sm:$0xff] %vm203_vm0, %v159_v6 }
  0xc5   : > { %v160_v7 = vpop.trf.xlu0 }
  0xc6   : > { %209 = vst.msk [vmem:[%s529_s20 + $0x28] sm:$0xff] %vm203_vm0, %v160_v7 }
  0xc9   : > { %v161_v8 = vpop.trf.xlu0 }
  0xca   : > { %210 = vst.msk [vmem:[%s529_s20 + $0x30] sm:$0xff] %vm203_vm0, %v161_v8 }
  0xcd   : > { %v162_v9 = vpop.trf.xlu0 }
  0xce   : > { %211 = vst.msk [vmem:[%s529_s20 + $0x38] sm:$0xff] %vm203_vm0, %v162_v9 }
  0xd1   : > { %v163_v10 = vpop.trf.xlu0 }
  0xd2   : > { %212 = vst.msk [vmem:[%s529_s20 + $0x40] sm:$0xff] %vm203_vm0, %v163_v10 }
  0xd5   : > { %v164_v11 = vpop.trf.xlu0 }
  0xd6   : > { %213 = vst.msk [vmem:[%s529_s20 + $0x48] sm:$0xff] %vm203_vm0, %v164_v11 }
  0xd9   : > { %v165_v12 = vpop.trf.xlu0 }
  0xda   : > { %214 = vst.msk [vmem:[%s529_s20 + $0x50] sm:$0xff] %vm203_vm0, %v165_v12 }
  0xdd   : > { %v166_v13 = vpop.trf.xlu0 }
  0xde   : > { %215 = vst.msk [vmem:[%s529_s20 + $0x58] sm:$0xff] %vm203_vm0, %v166_v13 }
  0xe1   : > { %v167_v14 = vpop.trf.xlu0 }
  0xe2   : > { %216 = vst.msk [vmem:[%s529_s20 + $0x60] sm:$0xff] %vm203_vm0, %v167_v14 }
  0xe5   : > { %v168_v15 = vpop.trf.xlu0 }
  0xe6   : > { %217 = vst.msk [vmem:[%s529_s20 + $0x68] sm:$0xff] %vm203_vm0, %v168_v15 }
  0xe9   : > { %v169_v16 = vpop.trf.xlu0 }
  0xea   : > { %218 = vst.msk [vmem:[%s529_s20 + $0x70] sm:$0xff] %vm203_vm0, %v169_v16 }
  0xed   : > { %v170_v17 = vpop.trf.xlu0 }
  0xee   : > { %219 = vst.msk [vmem:[%s529_s20 + $0x78] sm:$0xff] %vm203_vm0, %v170_v17 }
  0xf1   : > { %v187_v18 = vpop.trf.xlu0 }
  0xf2   : > { %220 = vst.msk [vmem:[%s529_s20 + $0x80] sm:$0xff] %vm203_vm0, %v187_v18 }
  0xf5   : > { %v188_v19 = vpop.trf.xlu0 }
  0xf6   : > { %221 = vst.msk [vmem:[%s529_s20 + $0x88] sm:$0xff] %vm203_vm0, %v188_v19 }
  0xf9   : > { %v189_v20 = vpop.trf.xlu0 }
  0xfa   : > { %222 = vst.msk [vmem:[%s529_s20 + $0x90] sm:$0xff] %vm203_vm0, %v189_v20 }
  0xfd   : > { %v190_v21 = vpop.trf.xlu0 }
  0xfe   : > { %223 = vst.msk [vmem:[%s529_s20 + $0x98] sm:$0xff] %vm203_vm0, %v190_v21 }
 0x101   : > { %v191_v22 = vpop.trf.xlu0 }
 0x102   : > { %224 = vst.msk [vmem:[%s529_s20 + $0xa0] sm:$0xff] %vm203_vm0, %v191_v22 }
 0x105   : > { %v192_v23 = vpop.trf.xlu0 }
 0x106   : > { %225 = vst.msk [vmem:[%s529_s20 + $0xa8] sm:$0xff] %vm203_vm0, %v192_v23 }
 0x109   : > { %v193_v24 = vpop.trf.xlu0 }
 0x10a   : > { %226 = vst.msk [vmem:[%s529_s20 + $0xb0] sm:$0xff] %vm203_vm0, %v193_v24 }
 0x10d   : > { %v194_v25 = vpop.trf.xlu0 }
 0x10e   : > { %227 = vst.msk [vmem:[%s529_s20 + $0xb8] sm:$0xff] %vm203_vm0, %v194_v25 }
 0x111   : > { %v195_v26 = vpop.trf.xlu0 }
 0x112   : > { %228 = vst.msk [vmem:[%s529_s20 + $0xc0] sm:$0xff] %vm203_vm0, %v195_v26 }
 0x115   : > { %v196_v27 = vpop.trf.xlu0 }
 0x116   : > { %229 = vst.msk [vmem:[%s529_s20 + $0xc8] sm:$0xff] %vm203_vm0, %v196_v27 }
 0x119   : > { %v197_v28 = vpop.trf.xlu0 }
 0x11a   : > { %230 = vst.msk [vmem:[%s529_s20 + $0xd0] sm:$0xff] %vm203_vm0, %v197_v28 }
 0x11d   : > { %v198_v29 = vpop.trf.xlu0 }
 0x11e   : > { %231 = vst.msk [vmem:[%s529_s20 + $0xd8] sm:$0xff] %vm203_vm0, %v198_v29 }
 0x121   : > { %v199_v30 = vpop.trf.xlu0 }
 0x122   : > { %232 = vst.msk [vmem:[%s529_s20 + $0xe0] sm:$0xff] %vm203_vm0, %v199_v30 }
 0x125   : > { %v200_v31 = vpop.trf.xlu0 }
 0x126   : > { %233 = vst.msk [vmem:[%s529_s20 + $0xe8] sm:$0xff] %vm203_vm0, %v200_v31 }
 0x129   : > { %v201_v32 = vpop.trf.xlu0 }
 0x12a   : > { %234 = vst.msk [vmem:[%s529_s20 + $0xf0] sm:$0xff] %vm203_vm0, %v201_v32 }
 0x12d   : > { %v202_v33 = vpop.trf.xlu0 }
 0x12e   : > { %235 = vst.msk [vmem:[%s529_s20 + $0xf8] sm:$0xff] %vm203_vm0, %v202_v33 }
 0x12f PF: > { %p11_p7 = scmp.ge.s32.totalorder %s457_s11, 4   ;;  %s614_s6 = smov %s414_s7 }
 0x130   : > { %s615_s7 = smov %s418_s8  ;;  %s616_s8 = smov %s467_s14 }
 0x131   : > { %s617_s9 = smov %s457_s11  ;;  %13 = sbr.rel (!%p11_p7) target bundleno = 3 (0x3), region = 64 }
 0x138   :  { %257 = vsyncpa [#allocation3], 1 }
 0x139   :  { %259 = vsyncpa [#allocation3 + $0x1], 1 }

</bundles_post_ra>
